<compile_context>
chip_gen: v6e
topology: v6e:2x2x1
jax: 0.10.0
libtpu: 0.0.40
codegen_flags: <defaults>
</compile_context>

<pallas_src>
import jax
import jax.numpy as jnp
from jax import lax
from jax.experimental import pallas as pl
from jax.experimental.pallas import tpu as pltpu


def _round_up(n, m):
    return ((n + m - 1) // m) * m


def logreg_kernel(x_ref, w_ref, b_ref, o_ref):
    """One batch tile of y = sigmoid(x @ W^T + b).

    x_ref: (TB, D) f32, VMEM (tiled along batch)
    w_ref: (1, D)  f32, VMEM (block-invariant across the grid)
    b_ref: (1,)    f32, SMEM (scalar)
    o_ref: (TB, 1) f32, VMEM
    """
    x = x_ref[...]
    d = x.shape[-1]
    if d <= 512:
        # Tiny feature dim: a (TB,D)x(D,1) matvec would use <1% of the MXU and
        # pay its push/result-FIFO latency for a single output column.  Do the
        # multiply on the VPU and the reduce on the XLU (both have idle slots).
        z = jnp.sum(x * w_ref[...], axis=-1, keepdims=True)           # (TB, 1)
    else:
        # Large feature dim: contraction is worth the MXU.
        z = lax.dot_general(
            x, w_ref[...],
            dimension_numbers=(((1,), (1,)), ((), ())),
            preferred_element_type=jnp.float32)                        # (TB, 1)
    z = z + b_ref[0]
    # sigmoid: exp on the EUP, add/div on the VPU
    o_ref[...] = (1.0 / (1.0 + jnp.exp(-z))).astype(o_ref.dtype)


def logistic_regression_forward(x, weight, bias, *, max_tile=512):
    """x: (B, D) f32; weight: (1, D) f32 (torch nn.Linear layout); bias: (1,) f32.

    Returns sigmoid(x @ weight.T + bias) with shape (B, 1).
    """
    B, D = x.shape

    # --- batch-tile size ------------------------------------------------------
    # Large tiles (>=512 rows) reach ~85% of HBM roofline, but the
    # double-buffered x tile (2 * TB * D * 4 bytes) must stay well under the
    # scoped VMEM limit (v7x only has 64 MiB physical / 32 MiB scoped).
    vmem_budget = 8 * 1024 * 1024                       # bytes for x double-buffer
    tb_vmem_cap = max(8, (vmem_budget // (2 * D * 4)) // 8 * 8)
    TB = max(8, min(max_tile, tb_vmem_cap, _round_up(B, 8)))

    # Pad batch so every grid step sees a full (TB, D) tile (TB multiple of 8).
    B_pad = _round_up(B, TB)
    if B_pad != B:
        x = jnp.pad(x, ((0, B_pad - B), (0, 0)))

    out = pl.pallas_call(
        logreg_kernel,
        out_shape=jax.ShapeDtypeStruct((B_pad, 1), jnp.float32),
        grid_spec=pltpu.PrefetchScalarGridSpec(
            num_scalar_prefetch=0,
            grid=(B_pad // TB,),
            in_specs=[
                # x: tiled along batch -> software-pipelined HBM->VMEM DMA
                pl.BlockSpec((TB, D), lambda i: (i, 0)),
                # weight: block-invariant, stays resident in VMEM
                pl.BlockSpec((1, D), lambda i: (0, 0)),
                # bias: single scalar in SMEM (no VMEM tile / DMA descriptor)
                pl.BlockSpec(memory_space=pltpu.MemorySpace.SMEM),
            ],
            out_specs=pl.BlockSpec((TB, 1), lambda i: (i, 0)),
        ),
        compiler_params=pltpu.CompilerParams(
            # Batch tiles are fully independent (no accumulator) -> parallel.
            dimension_semantics=("parallel",),
        ),
    )(x, weight, bias)

    return out[:B]


def reference_forward(x, weight, bias):
    return jax.nn.sigmoid(x @ weight.T + bias)


if __name__ == "__main__":
    key = jax.random.PRNGKey(0)
    k_x, k_w, k_b = jax.random.split(key, 3)

    batch = 8
    input_dim = 32  # stand-in for X_train_tensor.shape[1]

    x = jax.random.normal(k_x, (batch, input_dim), dtype=jnp.float32)

    # Deterministic init mimicking nn.Linear's uniform(-1/sqrt(fan_in), 1/sqrt(fan_in))
    bound = 1.0 / jnp.sqrt(jnp.float32(input_dim))
    weight = jax.random.uniform(k_w, (1, input_dim), minval=-bound, maxval=bound,
                                dtype=jnp.float32)
    bias = jax.random.uniform(k_b, (1,), minval=-bound, maxval=bound,
                              dtype=jnp.float32)

    # Small-shape run (matches the module's implied shapes).
    out = jax.block_until_ready(logistic_regression_forward(x, weight, bias))
    ref = reference_forward(x, weight, bias)
    assert out.shape == (batch, input_dim and 1), out.shape
    assert jnp.allclose(out, ref, atol=1e-5, rtol=1e-5), (out, ref)

    # Larger, non-multiple-of-tile batch: exercises tiling + padding + slicing.
    big_b = 600
    xb = jax.random.normal(k_x, (big_b, input_dim), dtype=jnp.float32)
    out_b = jax.block_until_ready(logistic_regression_forward(xb, weight, bias))
    ref_b = reference_forward(xb, weight, bias)
    assert out_b.shape == (big_b, 1), out_b.shape
    assert jnp.allclose(out_b, ref_b, atol=1e-5, rtol=1e-5)

    print("KERNEL_OK")
</pallas_src>

<mosaic_0001>
module attributes {stable_mosaic.version = 11 : i64} {
  func.func @logreg_kernel(%arg0: i32, %arg1: memref<8x32xf32, #tpu.memory_space<vmem>>, %arg2: memref<1x32xf32, #tpu.memory_space<vmem>>, %arg3: memref<1xf32, #tpu.memory_space<smem>>, %arg4: memref<8x1xf32, #tpu.memory_space<vmem>>) attributes {dimension_semantics = [#tpu.dimension_semantics<parallel>], iteration_bounds = array<i64: 1>, scalar_prefetch = 0 : i64, scratch_operands = 0 : i64, tpu.core_type = #tpu.core_type<tc>, window_params = [{transform_indices = @transform_0, window_bounds = array<i64: 8, 32>}, {pipeline_mode = #tpu.pipeline_mode<synchronous>, transform_indices = @transform_1, window_bounds = array<i64: 1, 32>}, {transform_indices = @transform_2, window_bounds = array<i64: 1>}, {transform_indices = @transform_3, window_bounds = array<i64: 8, 1>}]} {
    %c0 = arith.constant 0 : index
    %c0_0 = arith.constant 0 : index
    %0 = vector.load %arg1[%c0, %c0_0] : memref<8x32xf32, #tpu.memory_space<vmem>>, vector<8x32xf32>
    %c0_1 = arith.constant 0 : index
    %c0_2 = arith.constant 0 : index
    %1 = vector.load %arg2[%c0_1, %c0_2] : memref<1x32xf32, #tpu.memory_space<vmem>>, vector<1x32xf32>
    %2 = vector.broadcast %1 : vector<1x32xf32> to vector<8x32xf32>
    %3 = arith.mulf %0, %2 : vector<8x32xf32>
    %cst = arith.constant dense<0.000000e+00> : vector<8xf32>
    %4 = vector.multi_reduction <add>, %3, %cst [1] : vector<8x32xf32> to vector<8xf32>
    %5 = vector.shape_cast %4 : vector<8xf32> to vector<8x1xf32>
    %c0_3 = arith.constant 0 : index
    %6 = memref.load %arg3[%c0_3] : memref<1xf32, #tpu.memory_space<smem>>
    %7 = vector.broadcast %6 : f32 to vector<8x1xf32>
    %8 = arith.addf %5, %7 : vector<8x1xf32>
    %cst_4 = arith.constant 0.000000e+00 : f32
    %9 = vector.broadcast %cst_4 : f32 to vector<8x1xf32>
    %10 = arith.subf %9, %8 : vector<8x1xf32>
    %11 = math.exp %10 : vector<8x1xf32>
    %cst_5 = arith.constant 1.000000e+00 : f32
    %12 = vector.broadcast %cst_5 : f32 to vector<8x1xf32>
    %13 = arith.addf %12, %11 : vector<8x1xf32>
    %cst_6 = arith.constant 1.000000e+00 : f32
    %14 = vector.broadcast %cst_6 : f32 to vector<8x1xf32>
    %15 = arith.divf %14, %13 : vector<8x1xf32>
    %c0_7 = arith.constant 0 : index
    %c0_8 = arith.constant 0 : index
    %16 = vector.load %arg4[%c0_7, %c0_8] : memref<8x1xf32, #tpu.memory_space<vmem>>, vector<8x1xf32>
    tpu.vector_store %arg4[%c0_7, %c0_8], %15 {strides = array<i32>} : memref<8x1xf32, #tpu.memory_space<vmem>>, vector<8x1xf32>,
    return
  }
  func.func @transform_0(%arg0: i32) -> (i32, i32) {
    %c0_i32 = arith.constant 0 : i32
    %c0_i32_0 = arith.constant 0 : i32
    return %arg0, %c0_i32 : i32, i32
  }
  func.func @transform_1(%arg0: i32) -> (i32, i32) {
    %c0_i32 = arith.constant 0 : i32
    %c0_i32_0 = arith.constant 0 : i32
    %c0_i32_1 = arith.constant 0 : i32
    return %c0_i32, %c0_i32_0 : i32, i32
  }
  func.func @transform_2(%arg0: i32) -> i32 {
    %c0_i32 = arith.constant 0 : i32
    %c0_i32_0 = arith.constant 0 : i32
    return %c0_i32 : i32
  }
  func.func @transform_3(%arg0: i32) -> (i32, i32) {
    %c0_i32 = arith.constant 0 : i32
    %c0_i32_0 = arith.constant 0 : i32
    return %arg0, %c0_i32 : i32, i32
  }
}

</mosaic_0001>

<bundles_post_ra>
// kernel: tpu_custom_call.1
= control target key start
LH: loop header
LB: loop body
LE: loop exit
PB: predicated region body
PF: predicated region fallthrough
CT: control target
= control target key end

     0   :  { %9 = vsyncpa [#allocation4], 0  ;;  %s84_s12 = smov [#allocation3]   ;;  %s117_s0 = inlined_call_operand.hbm [shape: f32[8,32], index: 0, kind: input, shape index: {}]   ;;  %s118_s1 = inlined_call_operand.vmem [shape: f32[1,32], index: 1, kind: input, shape index: {}]   ;;  %s119_s2 = inlined_call_operand.<no memory space> [shape: f32[1], index: 2, kind: input, shape index: {}]   ;;  %s120_s3 = inlined_call_operand.vmem [shape: f32[8,1], index: 3, kind: output, shape index: {}]  }
   0x1   :  { %s16_s13 = sshll.u32 %s84_s12, 4  ;;  %s17_s13 = int_to_ptr.vmem [resolvable:$true] %s16_s13 }
   0x2   :  { %s70_s14 = scalar_lea.vmem %s17_s13, 128  ;;  %p75_p1 = scmp.lt.s32.totalorder %s17_s13, %s17_s13 }
   0x3   :  { %p71_p0 = scmp.ne.s32.totalorder %s17_s13, %s70_s14  ;;  %p76_p2 = scmp.lt.s32.totalorder %s70_s14, %s70_s14 }
   0x5   :  { %p77_p3 = por %p76_p2, %p75_p1 }
   0x7   :  { %p78_p4 = pnand %p77_p3, %p71_p0 }
   0x9   :  { %81 = shalt.err (!%p78_p4)
}
   0xa   :  { %19 = dma.hbm_to_vmem [thread:$0]  %s117_s0, 128, %s17_s13, [#allocation4]  }
   0xb   :  { %82 = dma.done.wait [#allocation4], 128  }
   0xc   :  { %83 = vsyncadd [#allocation4], 4294967168  ;;  %v27_v0 = vld [vmem:[#allocation3] sm:$0xff]  ;;  %vm36_vm0 = vcmask 261120   ;;  %v41_v4 = vstv %s119_s2  ;;  %vm49_vm1 = vcmask 7168  }
   0xd   :  { %v56_v1 = vld [vmem:[%s118_s1] ss:$0 sm:$0xff] }
   0xe   :  { %v35_v2 = vmul.f32 %v56_v1, %v27_v0 }
  0x10   :  { %v37_v3 = vsel %vm36_vm0, %v35_v2, 0.0 }
  0x11   :  { %38 = vadd.xlane.f32.xlu0 %v37_v3 }
  0x9a   :  { %v39_v5 = vpop.xlane.xlu0 %38 }
  0x9b   :  { %v42_v6 = vadd.f32 %v41_v4, %v39_v5 }
  0x9d   :  { %v43_v7 = vsub.f32 0.0, %v42_v6 }
  0x9f   :  { %v44_v8 = vmul.f32 1.442695, %v43_v7 }
  0xa1   :  { %58 = vpow2.f32 %v44_v8 }
  0xae   :  { %v59_v9 = vpop.eup %58 }
  0xaf   :  { %v46_v10 = vadd.f32 1.0, %v59_v9 }
  0xb1   :  { %60 = vrcp.f32 %v46_v10 }
  0xbe   :  { %v61_v11 = vpop.eup %60 }
  0xbf   :  { %50 = vst.msk [vmem:[%s120_s3] sm:$0xff] %vm49_vm1, %v61_v11 }
  0xc0   :  { %55 = vsyncpa [#allocation4], 1 }

</bundles_post_ra>
